<compile_context>
chip_gen: v6e
topology: v6e:2x2x1
jax: 0.10.0
libtpu: 0.0.40
codegen_flags: <defaults>
</compile_context>

<pallas_src>
import jax
import jax.numpy as jnp
from jax.experimental import pallas as pl
from jax.experimental.pallas import tpu as pltpu


N_TRACK = 10
N_WAYPOINTS = 3
SIDE_DIM = N_TRACK * 2          # 20 features per side (left or right)
IN_DIM = 2 * SIDE_DIM           # 40 (matches nn.Flatten of (B, 2, 10, 2))
HIDDEN = 128
OUT_DIM = N_WAYPOINTS * 2       # 6
_ALIGN = 16                     # bf16 packs 2 rows/sublane -> batch tiles % 16


def _mlp_kernel(left_ref, right_ref, w1l_ref, w1r_ref, b12_ref,
                w2_ref, w3_ref, b3_ref, o_ref):
    """Fused 3-layer MLP on one batch tile; activations stay in VMEM."""
    # Layer 1 with the stack+Flatten concat fused into split matmuls:
    #   x @ W1 == left @ W1[:20, :] + right @ W1[20:, :]
    # bf16 operands hit the MXU at native rate; accumulation is f32, and the
    # bias-add / ReLU stay in f32 (v5e has no bf16 VPU path).
    h1 = (jnp.dot(left_ref[...], w1l_ref[...], preferred_element_type=jnp.float32)
          + jnp.dot(right_ref[...], w1r_ref[...], preferred_element_type=jnp.float32)
          + b12_ref[0:1, :])
    h1 = jnp.maximum(h1, 0.0).astype(jnp.bfloat16)   # bf16 only as next-dot operand
    h2 = (jnp.dot(h1, w2_ref[...], preferred_element_type=jnp.float32)
          + b12_ref[1:2, :])
    h2 = jnp.maximum(h2, 0.0).astype(jnp.bfloat16)
    o_ref[...] = (jnp.dot(h2, w3_ref[...], preferred_element_type=jnp.float32)
                  + b3_ref[...])


def _round_up(x, m):
    return (x + m - 1) // m * m


def _choose_tiling(b, max_tile):
    """Pick (tb, num_tiles): minimize padding, keep tb a multiple of 16, and
    give the 'parallel' grid >=2 steps once the batch is big enough that
    splitting is free (keeps both v7x TensorCores busy)."""
    b_aligned = _round_up(b, _ALIGN)
    num_tiles = -(-b_aligned // max_tile)            # cdiv
    if num_tiles == 1 and b_aligned >= 2048:
        num_tiles = 2
    tb = _round_up(-(-b_aligned // num_tiles), _ALIGN)
    return tb, num_tiles


def mlp_planner_forward(track_left, track_right, params, *, max_tile=8192):
    """track_left/track_right: (B, n_track, 2) -> (B, n_waypoints, 2) float32.

    `params` weights are stored (in_features, out_features), with layer-1 rows
    ordered [left's 20 features | right's 20 features], i.e. exactly the
    torch.stack((left, right), dim=1) + Flatten ordering.  PyTorch nn.Linear
    stores (out, in): transpose checkpoints (and keep this row order) when
    importing, or the fused concat computes the wrong layer 1.
    """
    b = track_left.shape[0]
    # bf16 input streams: halves the dominant HBM read of the kernel.
    left = track_left.reshape(b, SIDE_DIM).astype(jnp.bfloat16)
    right = track_right.reshape(b, SIDE_DIM).astype(jnp.bfloat16)

    tb, num_tiles = _choose_tiling(b, max_tile)
    pad_b = tb * num_tiles
    if pad_b != b:
        pad = ((0, pad_b - b), (0, 0))
        left = jnp.pad(left, pad)
        right = jnp.pad(right, pad)

    w1, b1, w2, b2, w3, b3 = params
    w1 = w1.astype(jnp.bfloat16)
    w2 = w2.astype(jnp.bfloat16)
    w3 = w3.astype(jnp.bfloat16)
    w1l = w1[:SIDE_DIM]                                   # (20, 128)
    w1r = w1[SIDE_DIM:]                                   # (20, 128)
    b12 = jnp.concatenate([b1, b2], axis=0).astype(jnp.float32)   # (2, 128), one stream
    b3 = b3.astype(jnp.float32)

    def batch_spec(cols):
        return pl.BlockSpec((tb, cols), lambda i: (i, 0))

    def resident_spec(shape):
        # Constant index_map -> fetched once, stays resident in VMEM across steps.
        return pl.BlockSpec(shape, lambda i: (0, 0))

    out = pl.pallas_call(
        _mlp_kernel,
        out_shape=jax.ShapeDtypeStruct((pad_b, OUT_DIM), jnp.float32),
        grid=(num_tiles,),
        in_specs=[
            batch_spec(SIDE_DIM),                  # left  (TB, 20)  bf16
            batch_spec(SIDE_DIM),                  # right (TB, 20)  bf16
            resident_spec((SIDE_DIM, HIDDEN)),     # w1l   (20, 128) bf16
            resident_spec((SIDE_DIM, HIDDEN)),     # w1r   (20, 128) bf16
            resident_spec((2, HIDDEN)),            # b1|b2 (2, 128)  f32
            resident_spec((HIDDEN, HIDDEN)),       # w2    (128,128) bf16
            resident_spec((HIDDEN, OUT_DIM)),      # w3    (128, 6)  bf16
            resident_spec((1, OUT_DIM)),           # b3    (1, 6)    f32
        ],
        out_specs=batch_spec(OUT_DIM),             # (TB, 6) f32
        compiler_params=pltpu.CompilerParams(
            # Batch steps shard across v7x's two TensorCores; harmless on v5e/v6e.
            dimension_semantics=("parallel",),
            # Explicit scoped-VMEM budget: covers TB=8192 (h1/h2 dominate at
            # ~12 MiB) on all chips — above v5e's 16 MiB default, well under
            # v7x's 64 MiB physical per TC.
            vmem_limit_bytes=32 * 1024 * 1024,
        ),
    )(left, right, w1l, w1r, b12, w2, w3, b3)

    return out[:b].reshape(b, N_WAYPOINTS, 2)


def init_params(key):
    """nn.Linear-style init; weights stored (in, out) in bf16, biases in f32."""
    k1, k2, k3, k4, k5, k6 = jax.random.split(key, 6)

    def linear_init(kw, kb, fan_in, fan_out):
        bound = 1.0 / jnp.sqrt(fan_in)
        w = jax.random.uniform(kw, (fan_in, fan_out), jnp.float32, -bound, bound)
        bvec = jax.random.uniform(kb, (1, fan_out), jnp.float32, -bound, bound)
        return w.astype(jnp.bfloat16), bvec

    w1, b1 = linear_init(k1, k2, IN_DIM, HIDDEN)
    w2, b2 = linear_init(k3, k4, HIDDEN, HIDDEN)
    w3, b3 = linear_init(k5, k6, HIDDEN, OUT_DIM)
    return (w1, b1, w2, b2, w3, b3)


def _reference_forward(track_left, track_right, params):
    b = track_left.shape[0]
    # torch.stack((left, right), dim=1) -> (B, 2, n_track, 2); Flatten -> (B, 40)
    x = jnp.concatenate(
        [track_left.reshape(b, -1), track_right.reshape(b, -1)], axis=-1
    ).astype(jnp.float32)
    w1, b1, w2, b2, w3, b3 = params
    w1, w2, w3 = (w.astype(jnp.float32) for w in (w1, w2, w3))
    h1 = jnp.maximum(x @ w1 + b1, 0.0)
    h2 = jnp.maximum(h1 @ w2 + b2, 0.0)
    return (h2 @ w3 + b3).reshape(b, N_WAYPOINTS, 2)


if __name__ == "__main__":
    key = jax.random.PRNGKey(0)
    k_params, k_left, k_right = jax.random.split(key, 3)

    batch = 2
    params = init_params(k_params)
    track_left = jax.random.normal(k_left, (batch, N_TRACK, 2), jnp.float32)
    track_right = jax.random.normal(k_right, (batch, N_TRACK, 2), jnp.float32)

    out = jax.block_until_ready(mlp_planner_forward(track_left, track_right, params))
    ref = _reference_forward(track_left, track_right, params)
    assert out.shape == (batch, N_WAYPOINTS, 2), out.shape
    # bf16 inputs/activations vs f32 reference -> loose tolerance.
    assert jnp.allclose(out, ref, atol=3e-2, rtol=3e-2), "mismatch vs reference"

    # Exercise the multi-tile / padded path (4 grid steps, resident weights reused).
    batch2 = 50
    k_l2, k_r2 = jax.random.split(k_left)
    tl2 = jax.random.normal(k_l2, (batch2, N_TRACK, 2), jnp.float32)
    tr2 = jax.random.normal(k_r2, (batch2, N_TRACK, 2), jnp.float32)
    out2 = jax.block_until_ready(mlp_planner_forward(tl2, tr2, params, max_tile=16))
    ref2 = _reference_forward(tl2, tr2, params)
    assert out2.shape == (batch2, N_WAYPOINTS, 2), out2.shape
    assert jnp.allclose(out2, ref2, atol=3e-2, rtol=3e-2), "mismatch (tiled path)"

    print("KERNEL_OK")
</pallas_src>

<mosaic_0001>
module attributes {stable_mosaic.version = 11 : i64} {
  func.func @_mlp_kernel(%arg0: i32, %arg1: memref<16x20xbf16, #tpu.memory_space<vmem>>, %arg2: memref<16x20xbf16, #tpu.memory_space<vmem>>, %arg3: memref<20x128xbf16, #tpu.memory_space<vmem>>, %arg4: memref<20x128xbf16, #tpu.memory_space<vmem>>, %arg5: memref<2x128xf32, #tpu.memory_space<vmem>>, %arg6: memref<128x128xbf16, #tpu.memory_space<vmem>>, %arg7: memref<128x6xbf16, #tpu.memory_space<vmem>>, %arg8: memref<1x6xf32, #tpu.memory_space<vmem>>, %arg9: memref<16x6xf32, #tpu.memory_space<vmem>>) attributes {dimension_semantics = [#tpu.dimension_semantics<parallel>], iteration_bounds = array<i64: 1>, scalar_prefetch = 0 : i64, scratch_operands = 0 : i64, tpu.core_type = #tpu.core_type<tc>, window_params = [{transform_indices = @transform_0, window_bounds = array<i64: 16, 20>}, {transform_indices = @transform_1, window_bounds = array<i64: 16, 20>}, {pipeline_mode = #tpu.pipeline_mode<synchronous>, transform_indices = @transform_2, window_bounds = array<i64: 20, 128>}, {pipeline_mode = #tpu.pipeline_mode<synchronous>, transform_indices = @transform_3, window_bounds = array<i64: 20, 128>}, {pipeline_mode = #tpu.pipeline_mode<synchronous>, transform_indices = @transform_4, window_bounds = array<i64: 2, 128>}, {pipeline_mode = #tpu.pipeline_mode<synchronous>, transform_indices = @transform_5, window_bounds = array<i64: 128, 128>}, {pipeline_mode = #tpu.pipeline_mode<synchronous>, transform_indices = @transform_6, window_bounds = array<i64: 128, 6>}, {pipeline_mode = #tpu.pipeline_mode<synchronous>, transform_indices = @transform_7, window_bounds = array<i64: 1, 6>}, {transform_indices = @transform_8, window_bounds = array<i64: 16, 6>}]} {
    %c0 = arith.constant 0 : index
    %c0_0 = arith.constant 0 : index
    %0 = vector.load %arg1[%c0, %c0_0] : memref<16x20xbf16, #tpu.memory_space<vmem>>, vector<16x20xbf16>
    %c0_1 = arith.constant 0 : index
    %c0_2 = arith.constant 0 : index
    %1 = vector.load %arg3[%c0_1, %c0_2] : memref<20x128xbf16, #tpu.memory_space<vmem>>, vector<20x128xbf16>
    %cst = arith.constant dense<0.000000e+00> : vector<16x128xf32>
    %2 = tpu.matmul %0, %1, %cst {dimension_numbers = #tpu.dot_dimension_numbers<[1], [0], [0], [1], [0, 0, 1, 1], [], []>} : vector<16x20xbf16>, vector<20x128xbf16>, vector<16x128xf32> -> vector<16x128xf32>
    %c0_3 = arith.constant 0 : index
    %c0_4 = arith.constant 0 : index
    %3 = vector.load %arg2[%c0_3, %c0_4] : memref<16x20xbf16, #tpu.memory_space<vmem>>, vector<16x20xbf16>
    %c0_5 = arith.constant 0 : index
    %c0_6 = arith.constant 0 : index
    %4 = vector.load %arg4[%c0_5, %c0_6] : memref<20x128xbf16, #tpu.memory_space<vmem>>, vector<20x128xbf16>
    %cst_7 = arith.constant dense<0.000000e+00> : vector<16x128xf32>
    %5 = tpu.matmul %3, %4, %cst_7 {dimension_numbers = #tpu.dot_dimension_numbers<[1], [0], [0], [1], [0, 0, 1, 1], [], []>} : vector<16x20xbf16>, vector<20x128xbf16>, vector<16x128xf32> -> vector<16x128xf32>
    %6 = arith.addf %2, %5 : vector<16x128xf32>
    %c0_8 = arith.constant 0 : index
    %c0_9 = arith.constant 0 : index
    %7 = vector.load %arg5[%c0_8, %c0_9] : memref<2x128xf32, #tpu.memory_space<vmem>>, vector<1x128xf32>
    %8 = vector.broadcast %7 : vector<1x128xf32> to vector<16x128xf32>
    %9 = arith.addf %6, %8 : vector<16x128xf32>
    %cst_10 = arith.constant 0.000000e+00 : f32
    %10 = vector.broadcast %cst_10 : f32 to vector<16x128xf32>
    %11 = arith.maximumf %9, %10 : vector<16x128xf32>
    %12 = arith.truncf %11 : vector<16x128xf32> to vector<16x128xbf16>
    %c0_11 = arith.constant 0 : index
    %c0_12 = arith.constant 0 : index
    %13 = vector.load %arg6[%c0_11, %c0_12] : memref<128x128xbf16, #tpu.memory_space<vmem>>, vector<128x128xbf16>
    %cst_13 = arith.constant dense<0.000000e+00> : vector<16x128xf32>
    %14 = tpu.matmul %12, %13, %cst_13 {dimension_numbers = #tpu.dot_dimension_numbers<[1], [0], [0], [1], [0, 0, 1, 1], [], []>} : vector<16x128xbf16>, vector<128x128xbf16>, vector<16x128xf32> -> vector<16x128xf32>
    %c1 = arith.constant 1 : index
    %c0_14 = arith.constant 0 : index
    %15 = vector.load %arg5[%c1, %c0_14] : memref<2x128xf32, #tpu.memory_space<vmem>>, vector<1x128xf32>
    %16 = vector.broadcast %15 : vector<1x128xf32> to vector<16x128xf32>
    %17 = arith.addf %14, %16 : vector<16x128xf32>
    %cst_15 = arith.constant 0.000000e+00 : f32
    %18 = vector.broadcast %cst_15 : f32 to vector<16x128xf32>
    %19 = arith.maximumf %17, %18 : vector<16x128xf32>
    %20 = arith.truncf %19 : vector<16x128xf32> to vector<16x128xbf16>
    %c0_16 = arith.constant 0 : index
    %c0_17 = arith.constant 0 : index
    %21 = vector.load %arg7[%c0_16, %c0_17] : memref<128x6xbf16, #tpu.memory_space<vmem>>, vector<128x6xbf16>
    %cst_18 = arith.constant dense<0.000000e+00> : vector<16x6xf32>
    %22 = tpu.matmul %20, %21, %cst_18 {dimension_numbers = #tpu.dot_dimension_numbers<[1], [0], [0], [1], [0, 0, 1, 1], [], []>} : vector<16x128xbf16>, vector<128x6xbf16>, vector<16x6xf32> -> vector<16x6xf32>
    %c0_19 = arith.constant 0 : index
    %c0_20 = arith.constant 0 : index
    %23 = vector.load %arg8[%c0_19, %c0_20] : memref<1x6xf32, #tpu.memory_space<vmem>>, vector<1x6xf32>
    %24 = vector.broadcast %23 : vector<1x6xf32> to vector<16x6xf32>
    %25 = arith.addf %22, %24 : vector<16x6xf32>
    %c0_21 = arith.constant 0 : index
    %c0_22 = arith.constant 0 : index
    %26 = vector.load %arg9[%c0_21, %c0_22] : memref<16x6xf32, #tpu.memory_space<vmem>>, vector<16x6xf32>
    tpu.vector_store %arg9[%c0_21, %c0_22], %25 {strides = array<i32>} : memref<16x6xf32, #tpu.memory_space<vmem>>, vector<16x6xf32>,
    return
  }
  func.func @transform_0(%arg0: i32) -> (i32, i32) {
    %c0_i32 = arith.constant 0 : i32
    %c0_i32_0 = arith.constant 0 : i32
    return %arg0, %c0_i32 : i32, i32
  }
  func.func @transform_1(%arg0: i32) -> (i32, i32) {
    %c0_i32 = arith.constant 0 : i32
    %c0_i32_0 = arith.constant 0 : i32
    return %arg0, %c0_i32 : i32, i32
  }
  func.func @transform_2(%arg0: i32) -> (i32, i32) {
    %c0_i32 = arith.constant 0 : i32
    %c0_i32_0 = arith.constant 0 : i32
    %c0_i32_1 = arith.constant 0 : i32
    return %c0_i32, %c0_i32_0 : i32, i32
  }
  func.func @transform_3(%arg0: i32) -> (i32, i32) {
    %c0_i32 = arith.constant 0 : i32
    %c0_i32_0 = arith.constant 0 : i32
    %c0_i32_1 = arith.constant 0 : i32
    return %c0_i32, %c0_i32_0 : i32, i32
  }
  func.func @transform_4(%arg0: i32) -> (i32, i32) {
    %c0_i32 = arith.constant 0 : i32
    %c0_i32_0 = arith.constant 0 : i32
    %c0_i32_1 = arith.constant 0 : i32
    return %c0_i32, %c0_i32_0 : i32, i32
  }
  func.func @transform_5(%arg0: i32) -> (i32, i32) {
    %c0_i32 = arith.constant 0 : i32
    %c0_i32_0 = arith.constant 0 : i32
    %c0_i32_1 = arith.constant 0 : i32
    return %c0_i32, %c0_i32_0 : i32, i32
  }
  func.func @transform_6(%arg0: i32) -> (i32, i32) {
    %c0_i32 = arith.constant 0 : i32
    %c0_i32_0 = arith.constant 0 : i32
    %c0_i32_1 = arith.constant 0 : i32
    return %c0_i32, %c0_i32_0 : i32, i32
  }
  func.func @transform_7(%arg0: i32) -> (i32, i32) {
    %c0_i32 = arith.constant 0 : i32
    %c0_i32_0 = arith.constant 0 : i32
    %c0_i32_1 = arith.constant 0 : i32
    return %c0_i32, %c0_i32_0 : i32, i32
  }
  func.func @transform_8(%arg0: i32) -> (i32, i32) {
    %c0_i32 = arith.constant 0 : i32
    %c0_i32_0 = arith.constant 0 : i32
    return %arg0, %c0_i32 : i32, i32
  }
}

</mosaic_0001>

<bundles_post_ra>
// kernel: tpu_custom_call.1
= control target key start
LH: loop header
LB: loop body
LE: loop exit
PB: predicated region body
PF: predicated region fallthrough
CT: control target
= control target key end

     0   :  { %13 = vsyncpa [#allocation3], 0  ;;  %s841_s0 = inlined_call_operand.hbm [shape: bf16[16,20], index: 0, kind: input, shape index: {}]   ;;  %s842_s1 = inlined_call_operand.hbm [shape: bf16[16,20], index: 1, kind: input, shape index: {}]   ;;  %s843_s2 = inlined_call_operand.vmem [shape: bf16[20,128], index: 2, kind: input, shape index: {}]   ;;  %s844_s3 = inlined_call_operand.hbm [shape: bf16[20,128], index: 3, kind: input, shape index: {}]   ;;  %s845_s4 = inlined_call_operand.hbm [shape: f32[2,128], index: 4, kind: input, shape index: {}]   ;;  %s846_s5 = inlined_call_operand.vmem [shape: bf16[128,128], index: 5, kind: input, shape index: {}]   ;;  %s847_s6 = inlined_call_operand.vmem [shape: bf16[128,6], index: 6, kind: input, shape index: {}]   ;;  %s848_s7 = inlined_call_operand.vmem [shape: f32[1,6], index: 7, kind: input, shape index: {}]   ;;  %s849_s8 = inlined_call_operand.vmem [shape: f32[16,6], index: 8, kind: output, shape index: {}]  }
   0x1   :  { %14 = vsyncpa [#allocation5], 0 }
   0x2   :  { %15 = vsyncpa [#allocation8], 0  ;;  %s685_s27 = smov [#allocation4]   ;;  %s686_s29 = smov [#allocation2]  }
   0x3   :  { %s33_s28 = sshll.u32 %s685_s27, 4  ;;  %s21_s30 = sshll.u32 %s686_s29, 4  ;;  %s34_s28 = int_to_ptr.vmem [resolvable:$true] %s33_s28  ;;  %s22_s30 = int_to_ptr.vmem [resolvable:$true] %s21_s30 }
   0x4   :  { %s607_s9 = scalar_lea.vmem %s34_s28, 128  ;;  %p612_p1 = scmp.lt.s32.totalorder %s34_s28, %s34_s28 }
   0x5   :  { %p608_p0 = scmp.ne.s32.totalorder %s34_s28, %s607_s9  ;;  %p613_p2 = scmp.lt.s32.totalorder %s607_s9, %s607_s9 }
   0x7   :  { %p614_p3 = por %p613_p2, %p612_p1 }
   0x9   :  { %p615_p4 = pnand %p614_p3, %p608_p0 }
   0xb   :  { %618 = shalt.err (!%p615_p4)
}
   0xc   :  { %s687_s10 = smov 64   ;;  %s688_s11 = smov 4  }
   0xd   :  { %39 = dma.hbm_to_vmem [thread:$0]  %s842_s1, 128, %s34_s28, [#allocation5], %s687_s10, %s687_s10, %s688_s11  }
   0xe   :  { %s627_s14 = scalar_lea.vmem %s22_s30, 128  ;;  %p632_p6 = scmp.lt.s32.totalorder %s22_s30, %s22_s30 }
   0xf   :  { %p628_p5 = scmp.ne.s32.totalorder %s22_s30, %s627_s14  ;;  %p633_p7 = scmp.lt.s32.totalorder %s627_s14, %s627_s14 }
  0x11   :  { %p634_p8 = por %p633_p7, %p632_p6 }
  0x13   :  { %p635_p9 = pnand %p634_p8, %p628_p5 }
  0x15   :  { %638 = shalt.err (!%p635_p9)
}
  0x16   :  { %27 = dma.hbm_to_vmem [thread:$0]  %s841_s0, 128, %s22_s30, [#allocation3], %s687_s10, %s687_s10, %s688_s11  }
  0x17   :  { %s689_s17 = smov [#allocation6]   ;;  %s690_s19 = smov [#allocation7]  }
  0x18   :  { %s47_s18 = sshll.u32 %s689_s17, 4  ;;  %s60_s20 = sshll.u32 %s690_s19, 4  ;;  %s48_s18 = int_to_ptr.vmem [resolvable:$true] %s47_s18  ;;  %s61_s20 = int_to_ptr.vmem [resolvable:$true] %s60_s20 }
  0x19   :  { %s647_s21 = scalar_lea.vmem %s48_s18, 192  ;;  %p652_p11 = scmp.lt.s32.totalorder %s48_s18, %s48_s18 }
  0x1a   :  { %p648_p10 = scmp.ne.s32.totalorder %s48_s18, %s647_s21  ;;  %p653_p12 = scmp.lt.s32.totalorder %s647_s21, %s647_s21 }
  0x1c   :  { %p654_p13 = por %p653_p12, %p652_p11 }
  0x1e   :  { %p655_p0 = pnand %p654_p13, %p648_p10 }
  0x20   :  { %658 = shalt.err (!%p655_p0)
}
  0x21   :  { %53 = dma.hbm_to_vmem [thread:$0]  %s844_s3, 192, %s48_s18, [#allocation5], %s687_s10, %s687_s10, %s688_s11  }
  0x22   :  { %s667_s23 = scalar_lea.vmem %s61_s20, 32  ;;  %p672_p2 = scmp.lt.s32.totalorder %s61_s20, %s61_s20 }
  0x23   :  { %p668_p1 = scmp.ne.s32.totalorder %s61_s20, %s667_s23  ;;  %p673_p3 = scmp.lt.s32.totalorder %s667_s23, %s667_s23 }
  0x25   :  { %p674_p4 = por %p673_p3, %p672_p2 }
  0x27   :  { %p675_p5 = pnand %p674_p4, %p668_p1 }
  0x29   :  { %678 = shalt.err (!%p675_p5)
}
  0x2a   :  { %63 = dma.hbm_to_vmem [thread:$0]  %s845_s4, 32, %s61_s20, [#allocation8]  }
  0x2b   :  { %679 = dma.done.wait [#allocation3], 128  }
  0x2c   :  { %680 = vsyncadd [#allocation3], 4294967168 }
  0x2d   :  { %681 = dma.done.wait [#allocation5], 320  }
  0x2e   :  { %682 = vsyncadd [#allocation5], 4294966976 }
  0x2f   :  { %683 = dma.done.wait [#allocation8], 32  }
  0x30   :  { %684 = vsyncadd [#allocation8], 4294967264  ;;  %v691_v0 = vmov 0.0   ;;  %vm692_vm0 = vmmov 0   ;;  %vm111_vm1 = vcmask 1041408   ;;  %v579_v4 = vld [vmem:[#allocation6] sm:$0xff]  }
  0x31   :  { %513 = vmatprep.subr.bf16.mxu0 %v691_v0  ;;  %521 = vmatprep.subr.bf16.mxu1 %v691_v0  ;;  %v577_v1 = vld [vmem:[#allocation6 + $0x8] ss:$0 sps:$4 sm:$0x33]   ;;  %v578_v2 = vld [vmem:[%s843_s2 + $0x8] ss:$0 sps:$4 sm:$0x33]  }
  0x32   :  { %517 = vmatprep.mubr.msk.bf16.mxu0 %vm692_vm0, %v691_v0  ;;  %525 = vmatprep.mubr.msk.bf16.mxu1 %vm692_vm0, %v691_v0  ;;  %v113_v3 = vsel %vm111_vm1, %v577_v1, 0  ;;  %v174_v5 = vsel %vm111_vm1, %v578_v2, 0  ;;  %v580_v6 = vld [vmem:[%s843_s2] sm:$0xff]   ;;  %v581_v7 = vld [vmem:[#allocation4] sm:$0xff]   ;;  %vm107_vm2 = vcmask 162816   ;;  %v583_v9 = vld [vmem:[%s846_s5 + $0x38] sm:$0xff]  }
  0x33   :  { %514 = vmatpush3.bf16.msra.mxu0 %v113_v3  ;;  %522 = vmatpush3.bf16.msra.mxu1 %v174_v5  ;;  %v582_v8 = vld [vmem:[#allocation2] sm:$0xff]   ;;  %v584_v10 = vld [vmem:[%s846_s5 + $0x30] sm:$0xff]   ;;  %v585_v11 = vld [vmem:[%s846_s5 + $0x28] sm:$0xff]   ;;  %vm452_vm3 = vcmask 48128  }
  0x34   :  { %515 = vmatprep.subr.bf16.mxu0 %v691_v0  ;;  %523 = vmatprep.subr.bf16.mxu1 %v691_v0  ;;  %v586_v12 = vld [vmem:[%s846_s5 + $0x20] sm:$0xff]   ;;  %v587_v13 = vld [vmem:[%s846_s5 + $0x18] sm:$0xff]   ;;  %v588_v14 = vld [vmem:[%s846_s5 + $0x10] sm:$0xff]  }
  0x35   :  { %v589_v15 = vld [vmem:[%s846_s5 + $0x8] sm:$0xff]   ;;  %v590_v16 = vld [vmem:[%s846_s5] sm:$0xff]   ;;  %v591_v17 = vld [vmem:[%s847_s6 + $0x38] sm:$0xff]  }
  0x36   :  { %v592_v18 = vld [vmem:[%s847_s6 + $0x30] sm:$0xff]   ;;  %v593_v19 = vld [vmem:[%s847_s6 + $0x28] sm:$0xff]   ;;  %v594_v20 = vld [vmem:[%s847_s6 + $0x20] sm:$0xff]  }
  0x37   :  { %516 = vmatpush3.bf16.msra.mxu0 %v579_v4  ;;  %524 = vmatpush3.bf16.msra.mxu1 %v580_v6  ;;  %v595_v21 = vld [vmem:[%s847_s6 + $0x18] sm:$0xff]   ;;  %v596_v38 = vld [vmem:[%s847_s6 + $0x10] sm:$0xff]   ;;  %v597_v39 = vld [vmem:[%s847_s6 + $0x8] sm:$0xff]  }
  0x38   :  { %529 = vmatprep.subr.bf16.mxu0 %v691_v0  ;;  %549 = vmatprep.subr.bf16.mxu1 %v691_v0  ;;  %v470_v26 = vld [vmem:[#allocation7] ss:$0 sm:$0xff]  ;;  %v598_v40 = vld [vmem:[%s847_s6] sm:$0xff]   ;;  %v471_v41 = vld [vmem:[#allocation7 + $0x1] ss:$0 sm:$0xff] }
  0x39   :  { %v480_v51 = vld [vmem:[%s848_s7] ss:$0 sm:$0xff] }
  0x3a   :  { %518 = vmatmul.mubr.msk.bf16.vlgmr.msra.gmra.mxu0 %vm107_vm2, %v581_v7  ;;  %526 = vmatmul.mubr.msk.bf16.vlgmr.msra.gmra.mxu1 %vm107_vm2, %v582_v8 }
  0x3b   :  { %530 = vmatpush3.bf16.msra.mxu0 %v583_v9  ;;  %545 = vmatprep.mubr.msk.bf16.mxu0 %vm692_vm0, %v691_v0 }
  0x3c   :  { %531 = vmatprep.subr.bf16.mxu0 %v691_v0  ;;  %565 = vmatprep.mubr.msk.bf16.mxu1 %vm692_vm0, %v691_v0 }
  0x3d   :  { %550 = vmatpush3.bf16.msra.mxu1 %v591_v17 }
  0x3e   :  { %551 = vmatprep.subr.bf16.mxu1 %v691_v0 }
  0x3f   :  { %532 = vmatpush3.bf16.msra.mxu0 %v584_v10 }
  0x40   :  { %533 = vmatprep.subr.bf16.mxu0 %v691_v0 }
  0x41   :  { %552 = vmatpush3.bf16.msra.mxu1 %v592_v18 }
  0x42   :  { %553 = vmatprep.subr.bf16.mxu1 %v691_v0 }
  0x43   :  { %534 = vmatpush3.bf16.msra.mxu0 %v585_v11 }
  0x44   :  { %535 = vmatprep.subr.bf16.mxu0 %v691_v0 }
  0x45   :  { %554 = vmatpush3.bf16.msra.mxu1 %v593_v19 }
  0x46   :  { %555 = vmatprep.subr.bf16.mxu1 %v691_v0 }
  0x47   :  { %536 = vmatpush3.bf16.msra.mxu0 %v586_v12 }
  0x48   :  { %537 = vmatprep.subr.bf16.mxu0 %v691_v0 }
  0x49   :  { %556 = vmatpush3.bf16.msra.mxu1 %v594_v20 }
  0x4a   :  { %557 = vmatprep.subr.bf16.mxu1 %v691_v0 }
  0x4b   :  { %538 = vmatpush3.bf16.msra.mxu0 %v587_v13 }
  0x4c   :  { %539 = vmatprep.subr.bf16.mxu0 %v691_v0 }
  0x4d   :  { %558 = vmatpush3.bf16.msra.mxu1 %v595_v21 }
  0x4e   :  { %559 = vmatprep.subr.bf16.mxu1 %v691_v0 }
  0x4f   :  { %540 = vmatpush3.bf16.msra.mxu0 %v588_v14 }
  0x50   :  { %541 = vmatprep.subr.bf16.mxu0 %v691_v0 }
  0x51   :  { %560 = vmatpush3.bf16.msra.mxu1 %v596_v38 }
  0x52   :  { %561 = vmatprep.subr.bf16.mxu1 %v691_v0 }
  0x53   :  { %542 = vmatpush3.bf16.msra.mxu0 %v589_v15 }
  0x54   :  { %543 = vmatprep.subr.bf16.mxu0 %v691_v0 }
  0x55   :  { %562 = vmatpush3.bf16.msra.mxu1 %v597_v39 }
  0x56   :  { %563 = vmatprep.subr.bf16.mxu1 %v691_v0 }
  0x57   :  { %544 = vmatpush3.bf16.msra.mxu0 %v590_v16 }
  0x59   :  { %564 = vmatpush3.bf16.msra.mxu1 %v598_v40 }
  0xfa   :  { %v149_v22 = vpop.f32.mrf.mxu0  ;;  %v210_v23 = vpop.f32.mrf.mxu1 }
  0xfb   :  { %v211_v24 = vadd.f32 %v210_v23, %v149_v22 }
  0xfc   :  { %v519_v25 = vpop.f32.mrf.mxu0  ;;  %v527_v27 = vpop.f32.mrf.mxu1 }
  0xfd   :  { %v222_v30 = vadd.f32 %v470_v26, %v211_v24 }
  0xfe   :  { %v152_v28 = vpop.f32.mrf.mxu0  ;;  %v213_v29 = vpop.f32.mrf.mxu1 }
  0xff   :  { %v214_v31 = vadd.f32 %v213_v29, %v152_v28  ;;  %v224_v35 = vmax.f32 %v222_v30, 0.0 }
 0x100   :  { %v520_v32 = vpop.f32.mrf.mxu0  ;;  %v528_v33 = vpop.f32.mrf.mxu1 }
 0x101   :  { %v223_v34 = vadd.f32 %v470_v26, %v214_v31 }
 0x103   :  { %v225_v36 = vmax.f32 %v223_v34, 0.0 }
 0x105   :  { %v226_v37 = vpack.c.bf16 %v225_v36, %v224_v35 }
 0x107   :  { %546 = vmatmul.mubr.bf16.vlgmr.msra.gmra.mxu0 %v226_v37 }
 0x1c7   :  { %v330_v42 = vpop.f32.mrf.mxu0 }
 0x1c8   :  { %v331_v44 = vadd.f32 %v471_v41, %v330_v42 }
 0x1c9   :  { %v547_v43 = vpop.f32.mrf.mxu0 }
 0x1ca   :  { %v337_v48 = vmax.f32 %v331_v44, 0.0 }
 0x1cb   :  { %v333_v45 = vpop.f32.mrf.mxu0 }
 0x1cc   :  { %v334_v46 = vadd.f32 %v471_v41, %v333_v45 }
 0x1cd   :  { %v548_v47 = vpop.f32.mrf.mxu0 }
 0x1ce   :  { %v338_v49 = vmax.f32 %v334_v46, 0.0 }
 0x1d0   :  { %v339_v50 = vpack.c.bf16 %v338_v49, %v337_v48 }
 0x1d2   :  { %566 = vmatmul.mubr.bf16.vlgmr.msra.gmra.mxu1 %v339_v50 }
 0x292   :  { %v445_v52 = vpop.f32.mrf.mxu1 }
 0x293   :  { %v446_v53 = vadd.f32 %v480_v51, %v445_v52 }
 0x294   :  { %v567_v54 = vpop.f32.mrf.mxu1 }
 0x295   :  { %453 = vst.msk [vmem:[%s849_s8] sm:$0xff] %vm452_vm3, %v446_v53 }
 0x296   :  { %v448_v55 = vpop.f32.mrf.mxu1 }
 0x297   :  { %v449_v56 = vadd.f32 %v480_v51, %v448_v55 }
 0x298   :  { %v568_v57 = vpop.f32.mrf.mxu1 }
 0x299   :  { %454 = vst.msk [vmem:[%s849_s8 + $0x8] sm:$0xff] %vm452_vm3, %v449_v56 }
 0x29a   :  { %459 = vsyncpa [#allocation3], 1 }
 0x29b   :  { %460 = vsyncpa [#allocation5], 1 }
 0x29c   :  { %461 = vsyncpa [#allocation8], 1 }

</bundles_post_ra>
